<compile_context>
chip_gen: v7x
topology: tpu7x:2x2x1
jax: 0.10.0
libtpu: 0.0.40
codegen_flags: <defaults>
</compile_context>

<pallas_src>
import math
import functools

import jax
import jax.numpy as jnp
from jax import lax
from jax.experimental import pallas as pl
from jax.experimental.pallas import tpu as pltpu


def _token_embed_gather_kernel(tok_smem, table_hbm, out_ref, row_buf, sem,
                               *, scale, tile_n, window):
    # tok_smem:  (n_pad,)     int32  SMEM (scalar prefetch)
    # table_hbm: (vocab, E)   f32    HBM (no automatic DMA)
    # out_ref:   (tile_n, E)  f32    VMEM output tile
    # row_buf:   (tile_n, E)  f32    VMEM gather scratch
    # sem:       single DMA semaphore shared by all row copies
    base = pl.program_id(0) * tile_n

    def start_copy(j):
        tok = tok_smem[base + j]
        pltpu.make_async_copy(
            table_hbm.at[pl.ds(tok, 1)], row_buf.at[pl.ds(j, 1)], sem
        ).start()

    def wait_one():
        # All row copies are the same size; each wait retires one completion.
        pltpu.make_async_copy(
            table_hbm.at[pl.ds(0, 1)], row_buf.at[pl.ds(0, 1)], sem
        ).wait()

    # Prime an in-flight window of row DMAs.
    def _prime(j, carry):
        start_copy(j)
        return carry
    lax.fori_loop(0, window, _prime, 0)

    # Retire one copy per step while keeping the window full.
    def _step(j, carry):
        wait_one()

        @pl.when(j + window < tile_n)
        def _():
            start_copy(j + window)

        return carry
    lax.fori_loop(0, tile_n, _step, 0)

    # Fused sqrt(embedding_size) scaling on the way out.
    out_ref[...] = row_buf[...] * scale


def token_embedding(tokens, table, *, tile_n=128, dma_window=32):
    """tokens: (batch, seq) integer ids; table: (vocab, embed) f32 embedding table.
    Returns (batch, seq, embed) f32 == table[tokens] * sqrt(embed)."""
    batch, seq = tokens.shape
    vocab, embed = table.shape
    n = batch * seq
    n_pad = pl.cdiv(n, tile_n) * tile_n
    window = min(dma_window, tile_n)

    # Clip like jnp.take (nn.Embedding would raise on out-of-range ids); clipping
    # also keeps the row DMAs in bounds.  Padded slots gather row 0 and are sliced off.
    tok_flat = jnp.clip(tokens.astype(jnp.int32).reshape(n), 0, vocab - 1)
    if n_pad != n:
        tok_flat = jnp.pad(tok_flat, (0, n_pad - n))

    scale = float(math.sqrt(float(embed)))

    out_flat = pl.pallas_call(
        functools.partial(_token_embed_gather_kernel,
                          scale=scale, tile_n=tile_n, window=window),
        out_shape=jax.ShapeDtypeStruct((n_pad, embed), table.dtype),
        grid_spec=pltpu.PrefetchScalarGridSpec(
            num_scalar_prefetch=1,                       # token ids -> SMEM
            grid=(n_pad // tile_n,),
            in_specs=[pl.BlockSpec(memory_space=pl.ANY)],  # table stays in HBM
            out_specs=pl.BlockSpec((tile_n, embed), lambda i, tok_ref: (i, 0)),
            scratch_shapes=[
                pltpu.VMEM((tile_n, embed), table.dtype),  # gather buffer
                pltpu.SemaphoreType.DMA,                   # shared row-copy semaphore
            ],
        ),
        compiler_params=pltpu.CompilerParams(
            # Token tiles are independent -> shards across the 2 TCs on v7x,
            # harmless no-op on v5e/v6e.
            dimension_semantics=("parallel",)),
    )(tok_flat, table)

    return out_flat[:n].reshape(batch, seq, embed)


if __name__ == "__main__":
    # Small shapes consistent with TokenEmbedding; embed=128 keeps the output
    # tile lane-dense (multiple of 128).
    vocab_size = 128
    embedding_size = 128
    PAD_IDX = 0
    batch, seq = 2, 8

    key = jax.random.PRNGKey(0)
    k_tab, k_tok = jax.random.split(key)

    # nn.Embedding default init: N(0,1); padding_idx row is zero.
    table = jax.random.normal(k_tab, (vocab_size, embedding_size), dtype=jnp.float32)
    table = table.at[PAD_IDX].set(0.0)

    tokens = jax.random.randint(k_tok, (batch, seq), 0, vocab_size, dtype=jnp.int32)

    out = token_embedding(tokens, table)
    jax.block_until_ready(out)

    # Reference check (plain JAX gather + scale) — should match exactly.
    ref = jnp.take(table, tokens, axis=0) * math.sqrt(embedding_size)
    assert out.shape == (batch, seq, embedding_size)
    assert jnp.allclose(out, ref, atol=1e-5, rtol=1e-5)

    print("KERNEL_OK")
</pallas_src>

<mosaic_0001>
module attributes {stable_mosaic.version = 11 : i64} {
  func.func @_token_embed_gather_kernel(%arg0: i32, %arg1: memref<128xi32, #tpu.memory_space<smem>>, %arg2: memref<128x128xf32, #tpu.memory_space<any>>, %arg3: memref<128x128xf32, #tpu.memory_space<vmem>>, %arg4: memref<128x128xf32, #tpu.memory_space<vmem>>, %arg5: memref<!tpu.dma_semaphore, #tpu.memory_space<semaphore_mem>>) attributes {dimension_semantics = [#tpu.dimension_semantics<parallel>], iteration_bounds = array<i64: 1>, scalar_prefetch = 1 : i64, scratch_operands = 2 : i64, tpu.core_type = #tpu.core_type<tc>, window_params = [{}, {transform_indices = @transform_1, window_bounds = array<i64: 128, 128>}]} {
    %c128_i32 = arith.constant 128 : i32
    %0 = arith.muli %arg0, %c128_i32 : i32
    %c0_i32 = arith.constant 0 : i32
    %c32_i32 = arith.constant 32 : i32
    %1 = arith.addi %c0_i32, %c32_i32 : i32
    %c1_i32 = arith.constant 1 : i32
    scf.for %arg6 = %c0_i32 to %1 step %c1_i32  : i32 {
      %7 = arith.addi %0, %arg6 : i32
      %8 = arith.index_cast %7 : i32 to index
      %9 = memref.load %arg1[%8] : memref<128xi32, #tpu.memory_space<smem>>
      %c0_i32_8 = arith.constant 0 : i32
      %10 = tpu.memref_slice %arg2[%9, %c0_i32_8] : memref<128x128xf32, #tpu.memory_space<any>> -> memref<1x128xf32, #tpu.memory_space<any>>
      %c0_i32_9 = arith.constant 0 : i32
      %11 = tpu.memref_slice %arg4[%arg6, %c0_i32_9] : memref<128x128xf32, #tpu.memory_space<vmem>> -> memref<1x128xf32, #tpu.memory_space<vmem>>
      tpu.enqueue_dma source(%10 : memref<1x128xf32, #tpu.memory_space<any>>) target(%11 : memref<1x128xf32, #tpu.memory_space<vmem>>) target_semaphore(%arg5 : memref<!tpu.dma_semaphore, #tpu.memory_space<semaphore_mem>>)
    }
    %c32_i32_0 = arith.constant 32 : i32
    %c0_i32_1 = arith.constant 0 : i32
    %c128_i32_2 = arith.constant 128 : i32
    %2 = arith.addi %c0_i32_1, %c128_i32_2 : i32
    %c1_i32_3 = arith.constant 1 : i32
    scf.for %arg6 = %c0_i32_1 to %2 step %c1_i32_3  : i32 {
      %c0_i32_8 = arith.constant 0 : i32
      %c0_i32_9 = arith.constant 0 : i32
      %7 = tpu.memref_slice %arg2[%c0_i32_8, %c0_i32_9] : memref<128x128xf32, #tpu.memory_space<any>> -> memref<1x128xf32, #tpu.memory_space<any>>
      %c0_i32_10 = arith.constant 0 : i32
      %c0_i32_11 = arith.constant 0 : i32
      %8 = tpu.memref_slice %arg4[%c0_i32_10, %c0_i32_11] : memref<128x128xf32, #tpu.memory_space<vmem>> -> memref<1x128xf32, #tpu.memory_space<vmem>>
      tpu.wait_dma2 semaphore(%arg5 : memref<!tpu.dma_semaphore, #tpu.memory_space<semaphore_mem>>) src(%7 : memref<1x128xf32, #tpu.memory_space<any>>) dst(%8 : memref<1x128xf32, #tpu.memory_space<vmem>>)
      %c32_i32_12 = arith.constant 32 : i32
      %9 = arith.addi %arg6, %c32_i32_12 : i32
      %c128_i32_13 = arith.constant 128 : i32
      %10 = arith.cmpi slt, %9, %c128_i32_13 : i32
      %11 = arith.extui %10 : i1 to i32
      %c0_i32_14 = arith.constant 0 : i32
      %12 = arith.cmpi ne, %11, %c0_i32_14 : i32
      scf.if %12 {
        %c32_i32_15 = arith.constant 32 : i32
        %13 = arith.addi %arg6, %c32_i32_15 : i32
        %14 = arith.addi %0, %13 : i32
        %15 = arith.index_cast %14 : i32 to index
        %16 = memref.load %arg1[%15] : memref<128xi32, #tpu.memory_space<smem>>
        %c0_i32_16 = arith.constant 0 : i32
        %17 = tpu.memref_slice %arg2[%16, %c0_i32_16] : memref<128x128xf32, #tpu.memory_space<any>> -> memref<1x128xf32, #tpu.memory_space<any>>
        %c0_i32_17 = arith.constant 0 : i32
        %18 = tpu.memref_slice %arg4[%13, %c0_i32_17] : memref<128x128xf32, #tpu.memory_space<vmem>> -> memref<1x128xf32, #tpu.memory_space<vmem>>
        tpu.enqueue_dma source(%17 : memref<1x128xf32, #tpu.memory_space<any>>) target(%18 : memref<1x128xf32, #tpu.memory_space<vmem>>) target_semaphore(%arg5 : memref<!tpu.dma_semaphore, #tpu.memory_space<semaphore_mem>>)
      } else {
      }
    }
    %c128_i32_4 = arith.constant 128 : i32
    %c0 = arith.constant 0 : index
    %c0_5 = arith.constant 0 : index
    %3 = vector.load %arg4[%c0, %c0_5] : memref<128x128xf32, #tpu.memory_space<vmem>>, vector<128x128xf32>
    %cst = arith.constant 11.3137083 : f32
    %4 = vector.broadcast %cst : f32 to vector<128x128xf32>
    %5 = arith.mulf %3, %4 : vector<128x128xf32>
    %c0_6 = arith.constant 0 : index
    %c0_7 = arith.constant 0 : index
    %6 = vector.load %arg3[%c0_6, %c0_7] : memref<128x128xf32, #tpu.memory_space<vmem>>, vector<128x128xf32>
    tpu.vector_store %arg3[%c0_6, %c0_7], %5 {strides = array<i32>} : memref<128x128xf32, #tpu.memory_space<vmem>>, vector<128x128xf32>,
    return
  }
  func.func @transform_1(%arg0: i32, %arg1: memref<128xi32, #tpu.memory_space<smem>>) -> (i32, i32) {
    %c0_i32 = arith.constant 0 : i32
    %c0_i32_0 = arith.constant 0 : i32
    return %arg0, %c0_i32 : i32, i32
  }
}

</mosaic_0001>

<bundles_post_ra>
// kernel: tpu_custom_call.1
= control target key start
LH: loop header
LB: loop body
LE: loop exit
PB: predicated region body
PF: predicated region fallthrough
CT: control target
= control target key end

     0   :  { %s397_s0 = inlined_call_operand.hbm [shape: s32[128], index: 0, kind: input, shape index: {}]   ;;  %s398_s1 = inlined_call_operand.hbm [shape: f32[128,128], index: 1, kind: input, shape index: {}]   ;;  %s399_s2 = inlined_call_operand.hbm [shape: f32[128,128], index: 2, kind: output, shape index: {}]  }
   0x1   :  { %s181_s11 = scalar_lea.hbm %s397_s0, 16 }
   0x2   :  { %p182_p0 = scmp.ne.s32.totalorder %s397_s0, %s181_s11  ;;  %p185_p1 = scmp.lt.u32.totalorder %s181_s11, %s397_s0 }
   0x4   :  { %p187_p2 = pnand %p185_p1, %p182_p0 }
   0x6   :  { %190 = shalt.err (!%p187_p2)  }
   0x7   :  { %s287_s16 = smov [#allocation5]  }
   0x8   :  { %8 = dma.hbm_to_smem %s397_s0, 16, %s287_s16, [#allocation4] }
   0x9   :  { %273 = dma.done.wait [#allocation4], 16 }
   0xa   :  { %274 = vsyncadd [#allocation4], 4294967280 }
   0xb   :  { %10 = sfence }
   0xc   :  { %11 = vsyncpa [#allocation7], 0  ;;  %s319_s19 = smov 0  }
   0xd LB: > { %s20_s20 = sld [smem:[#allocation5 + %s281_s19]]  ;;  %s23_s21 = scalar_lea.vmem [#allocation2], %s281_s19  ;;  %s281_s19 = sphi %s319_s19, %s18_s19  }
   0xe   : > { %s31_s22 = sshll.u32 %s23_s21, 4  ;;  %s193_s29 = scalar_lea.hbm %s398_s1, 2048  ;;  %s32_s22 = int_to_ptr.vmem [resolvable:$true] %s31_s22 }
  0x13   : > { %s152_s23 = sshll.u32 %s20_s20, 4 }
  0x14   : > { %s22_s25 = scalar_lea.hbm %s398_s1, %s152_s23 }
  0x15   : > { %s191_s26 = scalar_lea.hbm %s22_s25, 16  ;;  %p194_p4 = scmp.lt.u32.totalorder %s22_s25, %s398_s1 }
  0x16   : > { %p192_p3 = scmp.ne.s32.totalorder %s22_s25, %s191_s26  ;;  %p195_p5 = scmp.lt.u32.totalorder %s193_s29, %s191_s26 }
  0x17   : > { %p197_p7 = scmp.lt.u32.totalorder %s191_s26, %s22_s25 }
  0x18   : > { %p196_p6 = por %p195_p5, %p194_p4 }
  0x1a   : > { %p198_p8 = por %p197_p7, %p196_p6 }
  0x1c   : > { %p199_p9 = pnand %p198_p8, %p192_p3 }
  0x1e   : > { %202 = shalt.err (!%p199_p9)  }
  0x1f   : > { %s203_s6 = scalar_lea.vmem %s32_s22, 16  ;;  %s288_s7 = smov [#allocation2]  }
  0x20   : > { %p204_p10 = scmp.ne.s32.totalorder %s32_s22, %s203_s6  ;;  %s205_s8 = sshll.u32 %s288_s7, 4  ;;  %s339_s8 = int_to_ptr.vmem [resolvable:$false] %s205_s8 }
  0x21   : > { %s207_s9 = scalar_lea.vmem %s339_s8, 2048  ;;  %p208_p11 = scmp.lt.s32.totalorder %s32_s22, %s339_s8 }
  0x22   : > { %p209_p12 = scmp.lt.s32.totalorder %s207_s9, %s203_s6 }
  0x24   : > { %p210_p13 = por %p209_p12, %p208_p11 }
  0x26   : > { %p211_p0 = pnand %p210_p13, %p204_p10 }
  0x28   : > { %214 = shalt.err (!%p211_p0)  }
  0x29   : > { %34 = dma.hbm_to_vmem [thread:$0]  %s22_s25, 16, %s32_s22, [#allocation3] }
  0x2a   : > { %s18_s19 = sadd.s32 1, %s281_s19  }
  0x2b   : > { %p15_p1 = scmp.ge.s32.totalorder %s18_s19, 32  }
  0x2c   :  { %s348_s10 = smov (%p15_p1), 0  }
  0x2d   :  { %17 = sbr.rel (!%p15_p1) target bundleno = 13 (0xd), region = 50 }
  0x34 LB: > { %275 = dma.done.wait [#allocation3], 16  ;;  %s285_s10 = sphi %s348_s10, %s40_s10  }
  0x35   : > { %276 = vsyncadd [#allocation3], 4294967280  ;;  %s44_s11 = sadd.s32 32, %s285_s10  ;;  %s140_s14 = scalar_lea.vmem [#allocation2], %s285_s10 }
  0x36   : > { %p354_p2 = scmp.lt.s32.totalorder %s44_s11, 128  ;;  %s141_s15 = scalar_lea.vmem %s140_s14, 32 [#allocation2] }
  0x37   : > { %s61_s17 = sshll.u32 %s141_s15, 4  ;;  %s62_s17 = int_to_ptr.vmem [resolvable:$true] %s61_s17 }
  0x38   : > { %s157_s13 = scalar_select %p354_p2, [#allocation5], [#allocation14] }
  0x39   : > { %s402_s11 = smov (!%p354_p2, %s44_s11), 0 }
  0x3a   : > { %s50_s16 = sld [smem:[%s157_s13 + %s402_s11]] }
  0x40   : > { %s154_s18 = sshll.u32 %s50_s16, 4 }
  0x41   : > { %s52_s21 = scalar_lea.hbm %s398_s1, %s154_s18 }
  0x42   : > { %s215_s22 = scalar_lea.hbm %s52_s21, 16  ;;  %p220_p6 = scmp.lt.u32.totalorder %s52_s21, %s398_s1 }
  0x43   : > { %p216_p3 = scmp.ne.s32.totalorder %s52_s21, %s215_s22  ;;  %p221_p7 = scmp.lt.u32.totalorder %s193_s29, %s215_s22 }
  0x44   : > { %p223_p9 = scmp.lt.u32.totalorder %s215_s22, %s52_s21 }
  0x45   : > { %p217_p4 = pnand %p216_p3, %p354_p2  ;;  %p222_p8 = por %p221_p7, %p220_p6 }
  0x47   : > { %p218_p5 = pneg %p217_p4  ;;  %p224_p10 = por %p223_p9, %p222_p8 }
  0x49   : > { %p225_p11 = pnand %p224_p10, %p218_p5 }
  0x4b   : > { %228 = shalt.err (!%p225_p11)  }
  0x4c   : > { %s229_s26 = scalar_lea.vmem %s62_s17, 16  ;;  %p236_p1 = scmp.lt.s32.totalorder %s62_s17, %s339_s8 }
  0x4d   : > { %p230_p12 = scmp.ne.s32.totalorder %s62_s17, %s229_s26  ;;  %p237_p3 = scmp.lt.s32.totalorder %s207_s9, %s229_s26 }
  0x4f   : > { %p231_p13 = pnand %p230_p12, %p354_p2  ;;  %p238_p4 = por %p237_p3, %p236_p1 }
  0x51   : > { %p232_p0 = pneg %p231_p13 }
  0x53   : > { %p239_p6 = pnand %p238_p4, %p232_p0 }
  0x55   : > { %242 = shalt.err (!%p239_p6)  }
  0x56   : > { %159 = dma.hbm_to_vmem [thread:$0]  (%p354_p2), %s52_s21, 16, %s62_s17, [#allocation3] }
  0x57   : > { %s40_s10 = sadd.s32 1, %s285_s10  }
  0x58   : > { %p37_p5 = scmp.ge.s32.totalorder %s40_s10, 128  }
  0x59   :  { %v65_v0 = vld [vmem:[#allocation2] sm:$0xff] (%p37_p5)  ;;  %v66_v1 = vld [vmem:[#allocation2 + $0x8] sm:$0xff] (%p37_p5)  ;;  %v67_v2 = vld [vmem:[#allocation2 + $0x10] sm:$0xff] (%p37_p5)  ;;  %s289_s1 = smov (%p37_p5), [#allocation6]  }
  0x5a   :  { %39 = sbr.rel (!%p37_p5) target bundleno = 52 (0x34), region = 61  ;;  %v81_v3 = vmul.f32 (%p37_p5), 11.313708, %v65_v0  ;;  %v82_v4 = vmul.f32 (%p37_p5), 11.313708, %v66_v1  ;;  %v68_v6 = vld [vmem:[#allocation2 + $0x18] sm:$0xff] (%p37_p5) }
  0x5b   :  { %v83_v5 = vmul.f32 (%p37_p5), 11.313708, %v67_v2  ;;  %v69_v7 = vld [vmem:[#allocation2 + $0x20] sm:$0xff] (%p37_p5)  ;;  %v70_v8 = vld [vmem:[#allocation2 + $0x28] sm:$0xff] (%p37_p5)  ;;  %v84_v9 = vmul.f32 (%p37_p5), 11.313708, %v68_v6 }
  0x5c   :  { %97 = vst [vmem:[#allocation6] sm:$0xff] (%p37_p5), %v81_v3  ;;  %98 = vst [vmem:[#allocation6 + $0x8] sm:$0xff] (%p37_p5), %v82_v4  ;;  %v85_v10 = vmul.f32 (%p37_p5), 11.313708, %v69_v7  ;;  %v86_v11 = vmul.f32 (%p37_p5), 11.313708, %v70_v8 }
  0x5d   :  { %99 = vst [vmem:[#allocation6 + $0x10] sm:$0xff] (%p37_p5), %v83_v5  ;;  %v71_v12 = vld [vmem:[#allocation2 + $0x30] sm:$0xff] (%p37_p5)  ;;  %v72_v13 = vld [vmem:[#allocation2 + $0x38] sm:$0xff] (%p37_p5)  ;;  %v73_v14 = vld [vmem:[#allocation2 + $0x40] sm:$0xff] (%p37_p5)  ;;  %s118_s27 = sshll.u32 (%p37_p5), %s289_s1, 4  ;;  %s119_s27 = int_to_ptr.vmem [resolvable:$true] %s118_s27 }
  0x5e   :  { %100 = vst [vmem:[#allocation6 + $0x18] sm:$0xff] (%p37_p5), %v84_v9  ;;  %101 = vst [vmem:[#allocation6 + $0x20] sm:$0xff] (%p37_p5), %v85_v10  ;;  %v87_v15 = vmul.f32 (%p37_p5), 11.313708, %v71_v12  ;;  %v88_v16 = vmul.f32 (%p37_p5), 11.313708, %v72_v13  ;;  %p248_p7 = scmp.lt.s32.totalorder (%p37_p5), %s119_s27, %s119_s27 }
  0x5f   :  { %102 = vst [vmem:[#allocation6 + $0x28] sm:$0xff] (%p37_p5), %v86_v11  ;;  %v89_v17 = vmul.f32 (%p37_p5), 11.313708, %v73_v14  ;;  %v74_v18 = vld [vmem:[#allocation2 + $0x48] sm:$0xff] (%p37_p5)  ;;  %v75_v19 = vld [vmem:[#allocation2 + $0x50] sm:$0xff] (%p37_p5)  ;;  %v76_v20 = vld [vmem:[#allocation2 + $0x58] sm:$0xff] (%p37_p5) }
  0x60   :  { %103 = vst [vmem:[#allocation6 + $0x30] sm:$0xff] (%p37_p5), %v87_v15  ;;  %104 = vst [vmem:[#allocation6 + $0x38] sm:$0xff] (%p37_p5), %v88_v16  ;;  %v90_v21 = vmul.f32 (%p37_p5), 11.313708, %v74_v18  ;;  %v91_v22 = vmul.f32 (%p37_p5), 11.313708, %v75_v19 }
  0x61   :  { %105 = vst [vmem:[#allocation6 + $0x40] sm:$0xff] %v89_v17  ;;  %v92_v23 = vmul.f32 11.313708, %v76_v20  ;;  %v77_v24 = vld [vmem:[#allocation2 + $0x60] sm:$0xff]  ;;  %v78_v25 = vld [vmem:[#allocation2 + $0x68] sm:$0xff]  ;;  %v79_v26 = vld [vmem:[#allocation2 + $0x70] sm:$0xff] }
  0x62   :  { %106 = vst [vmem:[#allocation6 + $0x48] sm:$0xff] %v90_v21  ;;  %107 = vst [vmem:[#allocation6 + $0x50] sm:$0xff] %v91_v22  ;;  %v93_v27 = vmul.f32 11.313708, %v77_v24  ;;  %v94_v28 = vmul.f32 11.313708, %v78_v25 }
  0x63   :  { %108 = vst [vmem:[#allocation6 + $0x58] sm:$0xff] %v92_v23  ;;  %v95_v29 = vmul.f32 11.313708, %v79_v26  ;;  %v80_v30 = vld [vmem:[#allocation2 + $0x78] sm:$0xff]  ;;  %s243_s28 = scalar_lea.vmem %s119_s27, 2048 }
  0x64   :  { %109 = vst [vmem:[#allocation6 + $0x60] sm:$0xff] %v93_v27  ;;  %110 = vst [vmem:[#allocation6 + $0x68] sm:$0xff] %v94_v28  ;;  %v96_v31 = vmul.f32 11.313708, %v80_v30  ;;  %p244_p2 = scmp.ne.s32.totalorder %s119_s27, %s243_s28  ;;  %p249_p8 = scmp.lt.s32.totalorder %s243_s28, %s243_s28 }
  0x65   :  { %111 = vst [vmem:[#allocation6 + $0x70] sm:$0xff] %v95_v29 }
  0x66   :  { %112 = vst [vmem:[#allocation6 + $0x78] sm:$0xff] %v96_v31  ;;  %p250_p9 = por %p249_p8, %p248_p7 }
  0x68   :  { %p251_p10 = pnand %p250_p9, %p244_p2 }
  0x6a   :  { %254 = shalt.err (!%p251_p10)
}
  0x6b   :  { %s255_s3 = scalar_lea.hbm %s399_s2, 2048 }
  0x6c   :  { %p256_p11 = scmp.ne.s32.totalorder %s399_s2, %s255_s3  ;;  %p259_p12 = scmp.lt.u32.totalorder %s255_s3, %s399_s2 }
  0x6e   :  { %p261_p13 = pnand %p259_p12, %p256_p11 }
  0x70   :  { %264 = shalt.err (!%p261_p13)
}
  0x71   :  { %s290_s8 = smov 128   ;;  %s291_s9 = smov 8  }
  0x72   :  { %124 = dma.vmem_to_hbm [thread:$0]  %s119_s27, 2048, %s399_s2, [#allocation7], %s290_s8, %s290_s8, %s291_s9  }
  0x73   :  { %277 = dma.done.wait [#allocation7], 2048  }
  0x74   :  { %278 = vsyncadd [#allocation7], 4294965248 }
  0x75   :  { %128 = vsyncpa [#allocation7], 1 }
  0x76   :  { %129 = vsyncmov [#allocation3] }
  0x79   :  { %s130_s12 = vpop.sfrf %129 }
  0x7a   :  { %p155_p0 = scmp.ne.s32.totalorder %s130_s12, 0 }
  0x7c   :  { %134 = shalt.err (%p155_p0)  }

</bundles_post_ra>
